<compile_context>
chip_gen: v5e
topology: v5e:2x2
jax: 0.10.0
libtpu: 0.0.40
codegen_flags: <defaults>
</compile_context>

<pallas_src>
import functools

import jax
import jax.numpy as jnp
from jax.experimental import pallas as pl
from jax.experimental.pallas import tpu as pltpu

HIDDEN1 = 128
HIDDEN2 = 128
_MAX_TB = 16384          # keeps the tile footprint safe under v7x's 64 MiB VMEM


def _round_up(x, m):
    return (x + m - 1) // m * m


def _policy_kernel(xT_ref, w1T_ref, b1_ref, w2T_ref, b2_ref, whT_ref, bh_ref,
                   out_ref, *, action_dims, compute_dtype):
    # Everything is transposed: batch lives on the lane (last) dimension.
    xT = xT_ref[...].astype(compute_dtype)                       # (S, tb)

    # inner_net: Linear + Tanh, Linear + Tanh (MXU matmuls, f32 accumulation).
    h1 = jnp.tanh(
        jnp.dot(w1T_ref[...], xT, preferred_element_type=jnp.float32)
        + b1_ref[...])                                           # (128, tb)
    h2 = jnp.tanh(
        jnp.dot(w2T_ref[...], h1.astype(compute_dtype),
                preferred_element_type=jnp.float32)
        + b2_ref[...])                                           # (128, tb)

    # Fused heads: one (head_rows, 128) @ (128, tb) matmul.  Rows [0, A) are
    # the mean head, [A, 2A) the stddev head, remainder is zero padding.
    t = jnp.tanh(
        jnp.dot(whT_ref[...], h2.astype(compute_dtype),
                preferred_element_type=jnp.float32)
        + bh_ref[...])                                           # (head_rows, tb)
    s = jnp.log1p(jnp.exp(t))            # softplus of tanh (t is in [-1, 1])

    row = jax.lax.broadcasted_iota(jnp.int32, t.shape, 0)
    out_ref[...] = jnp.where(row < action_dims, t, s)


def prepare_params(params, *, use_bf16_matmul=False):
    """One-time packing: transpose weights, fuse the two heads, reshape biases.

    Hoisted out of the forward call so an RL loop does not rebuild these in
    HBM on every policy evaluation.  bf16 operands are valid on v5e/v6e/v7x
    (f32 accumulation is kept); default f32 preserves 1e-5 exactness.
    """
    action_dims = params["wm"].shape[1]
    state_dims = params["w1"].shape[0]
    head_rows = _round_up(2 * action_dims, 8)

    w1T = params["w1"].T                                   # (128, S)
    w2T = params["w2"].T                                   # (128, 128)
    whT = jnp.zeros((head_rows, HIDDEN2), jnp.float32)
    whT = whT.at[:action_dims, :].set(params["wm"].T)
    whT = whT.at[action_dims:2 * action_dims, :].set(params["ws"].T)

    b1 = params["b1"].reshape(HIDDEN1, 1).astype(jnp.float32)
    b2 = params["b2"].reshape(HIDDEN2, 1).astype(jnp.float32)
    bh = jnp.zeros((head_rows, 1), jnp.float32)
    bh = bh.at[:action_dims, 0].set(params["bm"].reshape(-1))
    bh = bh.at[action_dims:2 * action_dims, 0].set(params["bs"].reshape(-1))

    compute_dtype = jnp.bfloat16 if use_bf16_matmul else jnp.float32
    if use_bf16_matmul:
        w1T = w1T.astype(jnp.bfloat16)
        w2T = w2T.astype(jnp.bfloat16)
        whT = whT.astype(jnp.bfloat16)

    return dict(w1T=w1T, b1=b1, w2T=w2T, b2=b2, whT=whT, bh=bh,
                state_dims=state_dims, action_dims=action_dims,
                head_rows=head_rows, compute_dtype=compute_dtype)


def _choose_batch_tile(batch, tile_batch):
    pb = _round_up(batch, 128)
    tb = min(_round_up(tile_batch, 128), pb, _MAX_TB)
    # v7x megacore: prefer >= 2 grid steps when the batch allows it
    # (harmless on v5e/v6e; never shrinks a tile below 128 lanes).
    half = _round_up(pl.cdiv(pb, 2), 128)
    if half < tb:
        tb = half
    padded = _round_up(batch, tb)
    return tb, padded


def policy_network_forward(x, prepared, *, tile_batch=8192):
    """x: (batch, state_dims) float32. Returns (action_means, action_stddevs)."""
    batch, state_dims = x.shape
    assert state_dims == prepared["state_dims"]
    action_dims = prepared["action_dims"]
    head_rows = prepared["head_rows"]
    compute_dtype = prepared["compute_dtype"]
    w1T, b1 = prepared["w1T"], prepared["b1"]
    w2T, b2 = prepared["w2T"], prepared["b2"]
    whT, bh = prepared["whT"], prepared["bh"]

    tb, padded_batch = _choose_batch_tile(batch, tile_batch)
    grid = (padded_batch // tb,)

    # Lane-major input: (state_dims, padded_batch), zero-padded batch columns.
    xT = jnp.pad(x.astype(jnp.float32), ((0, padded_batch - batch), (0, 0))).T

    kernel = functools.partial(
        _policy_kernel, action_dims=action_dims, compute_dtype=compute_dtype)

    # VMEM budget sized from the tile footprint (weights are resident and tiny).
    w_itemsize = jnp.dtype(compute_dtype).itemsize
    weight_bytes = ((w1T.size + w2T.size + whT.size) * w_itemsize
                    + (b1.size + b2.size + bh.size) * 4)
    per_col_bytes = 4 * (2 * _round_up(state_dims, 8)   # double-buffered xT tile
                         + 2 * head_rows                # double-buffered out tile
                         + HIDDEN1 + HIDDEN2)           # h1 / h2 intermediates
    vmem_limit = int(min(max(32 << 20,
                             2 * (per_col_bytes * tb + 2 * weight_bytes)),
                         48 << 20))

    cost = pl.CostEstimate(
        flops=2 * padded_batch * (state_dims * HIDDEN1
                                  + HIDDEN1 * HIDDEN2
                                  + HIDDEN2 * head_rows),
        transcendentals=padded_batch * (HIDDEN1 + HIDDEN2 + 3 * head_rows),
        bytes_accessed=(padded_batch * state_dims * 4
                        + padded_batch * head_rows * 4
                        + weight_bytes),
    )

    slab = pl.pallas_call(
        kernel,
        out_shape=jax.ShapeDtypeStruct((head_rows, padded_batch), jnp.float32),
        grid=grid,
        in_specs=[
            pl.BlockSpec((state_dims, tb), lambda i: (0, i)),      # xT (streamed)
            pl.BlockSpec((HIDDEN1, state_dims), lambda i: (0, 0)),  # W1^T (resident)
            pl.BlockSpec((HIDDEN1, 1), lambda i: (0, 0)),           # b1
            pl.BlockSpec((HIDDEN2, HIDDEN1), lambda i: (0, 0)),     # W2^T
            pl.BlockSpec((HIDDEN2, 1), lambda i: (0, 0)),           # b2
            pl.BlockSpec((head_rows, HIDDEN2), lambda i: (0, 0)),   # fused heads W^T
            pl.BlockSpec((head_rows, 1), lambda i: (0, 0)),         # fused heads b
        ],
        out_specs=pl.BlockSpec((head_rows, tb), lambda i: (0, i)),
        compiler_params=pltpu.CompilerParams(
            dimension_semantics=("parallel",),
            vmem_limit_bytes=vmem_limit),
        cost_estimate=cost,
    )(xT, w1T, b1, w2T, b2, whT, bh)

    means = slab[:action_dims, :batch].T
    stds = slab[action_dims:2 * action_dims, :batch].T
    return means, stds


def init_params(key, state_dims, action_dims):
    """Deterministic synthetic init (PyTorch-style uniform bounds)."""
    ks = jax.random.split(key, 8)

    def lin(kw, kb, fan_in, fan_out):
        bound = 1.0 / jnp.sqrt(fan_in)
        w = jax.random.uniform(kw, (fan_in, fan_out), jnp.float32, -bound, bound)
        b = jax.random.uniform(kb, (1, fan_out), jnp.float32, -bound, bound)
        return w, b

    w1, b1 = lin(ks[0], ks[1], state_dims, HIDDEN1)
    w2, b2 = lin(ks[2], ks[3], HIDDEN1, HIDDEN2)
    wm, bm = lin(ks[4], ks[5], HIDDEN2, action_dims)
    ws, bs = lin(ks[6], ks[7], HIDDEN2, action_dims)
    return dict(w1=w1, b1=b1, w2=w2, b2=b2, wm=wm, bm=bm, ws=ws, bs=bs)


def reference_forward(x, p):
    h1 = jnp.tanh(x @ p["w1"] + p["b1"])
    h2 = jnp.tanh(h1 @ p["w2"] + p["b2"])
    mean = jnp.tanh(h2 @ p["wm"] + p["bm"])
    std = jnp.log(1.0 + jnp.exp(jnp.tanh(h2 @ p["ws"] + p["bs"])))
    return mean, std


if __name__ == "__main__":
    key = jax.random.PRNGKey(0)
    k_x, k_p, k_x2 = jax.random.split(key, 3)

    batch = 8
    state_dims = 4
    action_dims = 2

    x = jax.random.normal(k_x, (batch, state_dims), jnp.float32)
    params = init_params(k_p, state_dims, action_dims)
    prepared = prepare_params(params)          # one-time packing, reused per call

    # Small, single-tile case (f32 operands -> exact 1e-5 match).
    means, stddevs = policy_network_forward(x, prepared)
    jax.block_until_ready((means, stddevs))
    ref_means, ref_stddevs = reference_forward(x, params)
    assert means.shape == (batch, action_dims)
    assert stddevs.shape == (batch, action_dims)
    assert jnp.allclose(means, ref_means, atol=1e-5, rtol=1e-5)
    assert jnp.allclose(stddevs, ref_stddevs, atol=1e-5, rtol=1e-5)

    # Multi-tile case: exercises the batch grid + lane-padding path.
    batch2 = 300
    x2 = jax.random.normal(k_x2, (batch2, state_dims), jnp.float32)
    means2, stddevs2 = policy_network_forward(x2, prepared, tile_batch=128)
    jax.block_until_ready((means2, stddevs2))
    ref_means2, ref_stddevs2 = reference_forward(x2, params)
    assert means2.shape == (batch2, action_dims)
    assert stddevs2.shape == (batch2, action_dims)
    assert jnp.allclose(means2, ref_means2, atol=1e-5, rtol=1e-5)
    assert jnp.allclose(stddevs2, ref_stddevs2, atol=1e-5, rtol=1e-5)

    print("KERNEL_OK")
</pallas_src>

<mosaic_0001>
module attributes {stable_mosaic.version = 11 : i64} {
  func.func @_policy_kernel(%arg0: i32, %arg1: memref<4x128xf32, #tpu.memory_space<vmem>>, %arg2: memref<128x4xf32, #tpu.memory_space<vmem>>, %arg3: memref<128x1xf32, #tpu.memory_space<vmem>>, %arg4: memref<128x128xf32, #tpu.memory_space<vmem>>, %arg5: memref<128x1xf32, #tpu.memory_space<vmem>>, %arg6: memref<8x128xf32, #tpu.memory_space<vmem>>, %arg7: memref<8x1xf32, #tpu.memory_space<vmem>>, %arg8: memref<8x128xf32, #tpu.memory_space<vmem>>) attributes {dimension_semantics = [#tpu.dimension_semantics<parallel>], iteration_bounds = array<i64: 1>, scalar_prefetch = 0 : i64, scratch_operands = 0 : i64, tpu.core_type = #tpu.core_type<tc>, window_params = [{transform_indices = @transform_0, window_bounds = array<i64: 4, 128>}, {pipeline_mode = #tpu.pipeline_mode<synchronous>, transform_indices = @transform_1, window_bounds = array<i64: 128, 4>}, {pipeline_mode = #tpu.pipeline_mode<synchronous>, transform_indices = @transform_2, window_bounds = array<i64: 128, 1>}, {pipeline_mode = #tpu.pipeline_mode<synchronous>, transform_indices = @transform_3, window_bounds = array<i64: 128, 128>}, {pipeline_mode = #tpu.pipeline_mode<synchronous>, transform_indices = @transform_4, window_bounds = array<i64: 128, 1>}, {pipeline_mode = #tpu.pipeline_mode<synchronous>, transform_indices = @transform_5, window_bounds = array<i64: 8, 128>}, {pipeline_mode = #tpu.pipeline_mode<synchronous>, transform_indices = @transform_6, window_bounds = array<i64: 8, 1>}, {transform_indices = @transform_7, window_bounds = array<i64: 8, 128>}]} {
    %c0 = arith.constant 0 : index
    %c0_0 = arith.constant 0 : index
    %0 = vector.load %arg1[%c0, %c0_0] : memref<4x128xf32, #tpu.memory_space<vmem>>, vector<4x128xf32>
    %c0_1 = arith.constant 0 : index
    %c0_2 = arith.constant 0 : index
    %1 = vector.load %arg2[%c0_1, %c0_2] : memref<128x4xf32, #tpu.memory_space<vmem>>, vector<128x4xf32>
    %cst = arith.constant dense<0.000000e+00> : vector<128x128xf32>
    %2 = tpu.matmul %1, %0, %cst {dimension_numbers = #tpu.dot_dimension_numbers<[1], [0], [0], [1], [0, 0, 1, 1], [], []>} : vector<128x4xf32>, vector<4x128xf32>, vector<128x128xf32> -> vector<128x128xf32>
    %c0_3 = arith.constant 0 : index
    %c0_4 = arith.constant 0 : index
    %3 = vector.load %arg3[%c0_3, %c0_4] : memref<128x1xf32, #tpu.memory_space<vmem>>, vector<128x1xf32>
    %4 = vector.broadcast %3 : vector<128x1xf32> to vector<128x128xf32>
    %5 = arith.addf %2, %4 : vector<128x128xf32>
    %6 = math.tanh %5 : vector<128x128xf32>
    %c0_5 = arith.constant 0 : index
    %c0_6 = arith.constant 0 : index
    %7 = vector.load %arg4[%c0_5, %c0_6] : memref<128x128xf32, #tpu.memory_space<vmem>>, vector<128x128xf32>
    %cst_7 = arith.constant dense<0.000000e+00> : vector<128x128xf32>
    %8 = tpu.matmul %7, %6, %cst_7 {dimension_numbers = #tpu.dot_dimension_numbers<[1], [0], [0], [1], [0, 0, 1, 1], [], []>} : vector<128x128xf32>, vector<128x128xf32>, vector<128x128xf32> -> vector<128x128xf32>
    %c0_8 = arith.constant 0 : index
    %c0_9 = arith.constant 0 : index
    %9 = vector.load %arg5[%c0_8, %c0_9] : memref<128x1xf32, #tpu.memory_space<vmem>>, vector<128x1xf32>
    %10 = vector.broadcast %9 : vector<128x1xf32> to vector<128x128xf32>
    %11 = arith.addf %8, %10 : vector<128x128xf32>
    %12 = math.tanh %11 : vector<128x128xf32>
    %c0_10 = arith.constant 0 : index
    %c0_11 = arith.constant 0 : index
    %13 = vector.load %arg6[%c0_10, %c0_11] : memref<8x128xf32, #tpu.memory_space<vmem>>, vector<8x128xf32>
    %cst_12 = arith.constant dense<0.000000e+00> : vector<8x128xf32>
    %14 = tpu.matmul %13, %12, %cst_12 {dimension_numbers = #tpu.dot_dimension_numbers<[1], [0], [0], [1], [0, 0, 1, 1], [], []>} : vector<8x128xf32>, vector<128x128xf32>, vector<8x128xf32> -> vector<8x128xf32>
    %c0_13 = arith.constant 0 : index
    %c0_14 = arith.constant 0 : index
    %15 = vector.load %arg7[%c0_13, %c0_14] : memref<8x1xf32, #tpu.memory_space<vmem>>, vector<8x1xf32>
    %16 = vector.broadcast %15 : vector<8x1xf32> to vector<8x128xf32>
    %17 = arith.addf %14, %16 : vector<8x128xf32>
    %18 = math.tanh %17 : vector<8x128xf32>
    %19 = math.exp %18 : vector<8x128xf32>
    %20 = math.log1p %19 : vector<8x128xf32>
    %21 = tpu.iota {dimensions = array<i32: 0>} : vector<8x128xi32>
    %c2_i32 = arith.constant 2 : i32
    %22 = vector.broadcast %c2_i32 : i32 to vector<8x128xi32>
    %23 = arith.cmpi slt, %21, %22 : vector<8x128xi32>
    %24 = arith.select %23, %18, %20 : vector<8x128xi1>, vector<8x128xf32>
    %c0_15 = arith.constant 0 : index
    %c0_16 = arith.constant 0 : index
    %25 = vector.load %arg8[%c0_15, %c0_16] : memref<8x128xf32, #tpu.memory_space<vmem>>, vector<8x128xf32>
    tpu.vector_store %arg8[%c0_15, %c0_16], %24 {strides = array<i32>} : memref<8x128xf32, #tpu.memory_space<vmem>>, vector<8x128xf32>,
    return
  }
  func.func @transform_0(%arg0: i32) -> (i32, i32) {
    %c0_i32 = arith.constant 0 : i32
    %c0_i32_0 = arith.constant 0 : i32
    return %c0_i32, %arg0 : i32, i32
  }
  func.func @transform_1(%arg0: i32) -> (i32, i32) {
    %c0_i32 = arith.constant 0 : i32
    %c0_i32_0 = arith.constant 0 : i32
    %c0_i32_1 = arith.constant 0 : i32
    return %c0_i32, %c0_i32_0 : i32, i32
  }
  func.func @transform_2(%arg0: i32) -> (i32, i32) {
    %c0_i32 = arith.constant 0 : i32
    %c0_i32_0 = arith.constant 0 : i32
    %c0_i32_1 = arith.constant 0 : i32
    return %c0_i32, %c0_i32_0 : i32, i32
  }
  func.func @transform_3(%arg0: i32) -> (i32, i32) {
    %c0_i32 = arith.constant 0 : i32
    %c0_i32_0 = arith.constant 0 : i32
    %c0_i32_1 = arith.constant 0 : i32
    return %c0_i32, %c0_i32_0 : i32, i32
  }
  func.func @transform_4(%arg0: i32) -> (i32, i32) {
    %c0_i32 = arith.constant 0 : i32
    %c0_i32_0 = arith.constant 0 : i32
    %c0_i32_1 = arith.constant 0 : i32
    return %c0_i32, %c0_i32_0 : i32, i32
  }
  func.func @transform_5(%arg0: i32) -> (i32, i32) {
    %c0_i32 = arith.constant 0 : i32
    %c0_i32_0 = arith.constant 0 : i32
    %c0_i32_1 = arith.constant 0 : i32
    return %c0_i32, %c0_i32_0 : i32, i32
  }
  func.func @transform_6(%arg0: i32) -> (i32, i32) {
    %c0_i32 = arith.constant 0 : i32
    %c0_i32_0 = arith.constant 0 : i32
    %c0_i32_1 = arith.constant 0 : i32
    return %c0_i32, %c0_i32_0 : i32, i32
  }
  func.func @transform_7(%arg0: i32) -> (i32, i32) {
    %c0_i32 = arith.constant 0 : i32
    %c0_i32_0 = arith.constant 0 : i32
    return %c0_i32, %arg0 : i32, i32
  }
}

</mosaic_0001>

<bundles_post_ra>
// kernel: tpu_custom_call.1
= control target key start
LH: loop header
LB: loop body
LE: loop exit
PB: predicated region body
PF: predicated region fallthrough
CT: control target
= control target key end

     0   :  { %vm189_vm0 = vcmask 1043456   ;;  %v662_v3 = vmov 0   ;;  %vm140_vm1 = vcmask 31744   ;;  %s945_s0 = inlined_call_operand.vmem [shape: f32[4,128], index: 0, kind: input, shape index: {}]   ;;  %s946_s1 = inlined_call_operand.vmem [shape: f32[128,4], index: 1, kind: input, shape index: {}]   ;;  %s947_s2 = inlined_call_operand.vmem [shape: f32[128,1], index: 2, kind: input, shape index: {}]   ;;  %s948_s3 = inlined_call_operand.vmem [shape: f32[128,128], index: 3, kind: input, shape index: {}]   ;;  %s949_s4 = inlined_call_operand.vmem [shape: f32[128,1], index: 4, kind: input, shape index: {}]   ;;  %s950_s5 = inlined_call_operand.vmem [shape: f32[8,128], index: 5, kind: input, shape index: {}]   ;;  %s951_s6 = inlined_call_operand.vmem [shape: f32[8,1], index: 6, kind: input, shape index: {}]   ;;  %s952_s7 = inlined_call_operand.hbm [shape: f32[8,128], index: 7, kind: output, shape index: {}]  }
   0x1   :  { %v27_v0 = vld [vmem:[%s945_s0] sm:$0xf]  ;;  %v59_v1 = vld [vmem:[%s947_s2 + $0x78] sm:$0xff]  ;;  %v57_v2 = vld [vmem:[%s947_s2 + $0x68] sm:$0xff]  ;;  %564 = vset.pattern.permute.xlu1 %v662_v3  ;;  %563 = vset.pattern.permute.xlu0 %v662_v3 }
   0x2   :  { %v28_v4 = vld [vmem:[%s946_s1] sm:$0xff]  ;;  %v39_v5 = vld [vmem:[%s946_s1 + $0x58] sm:$0xff]  ;;  %527 = vmatpush.msk.msra.mxu0 %vm189_vm0, %v27_v0  ;;  %544 = vmatpush.msk.msra.mxu2 %vm189_vm0, %v27_v0  ;;  %v58_v7 = vld [vmem:[%s947_s2 + $0x70] sm:$0xff] }
   0x3   :  { %137 = vperm.xlu0 %563, %v59_v1   ;;  %127 = vperm.xlu1 %564, %v57_v2   ;;  %v55_v6 = vld [vmem:[%s947_s2 + $0x58] sm:$0xff]  ;;  %v56_v8 = vld [vmem:[%s947_s2 + $0x60] sm:$0xff] }
   0x4   :  { %528 = vmatmul.msk.f32.vlgmr.msra.gmra.mxu0 %vm140_vm1, %v28_v4  ;;  %539 = vmatmul.msk.f32.vlgmr.msra.gmra.mxu2 %vm140_vm1, %v39_v5 }
   0x5   :  { %565 = vset.pattern.permute.xlu2 %v662_v3 }
   0x6   :  { %117 = vperm.xlu2 %565, %v55_v6  }
   0x7   :  { %12 = vsyncpa [#allocation3], 0  ;;  %v29_v9 = vld [vmem:[%s946_s1 + $0x8] sm:$0xff]  ;;  %v40_v10 = vld [vmem:[%s946_s1 + $0x60] sm:$0xff]  ;;  %s518_s8 = sshll.u32 %s952_s7, 4  ;;  %s519_s8 = int_to_ptr.hbm [resolvable:$true] %s518_s8 }
   0x8   :  { %v54_v11 = vld [vmem:[%s947_s2 + $0x50] sm:$0xff]  ;;  %v53_v12 = vld [vmem:[%s947_s2 + $0x48] sm:$0xff]  ;;  %v52_v13 = vld [vmem:[%s947_s2 + $0x40] sm:$0xff] }
   0x9   :  { %v30_v14 = vld [vmem:[%s946_s1 + $0x10] sm:$0xff]  ;;  %v41_v15 = vld [vmem:[%s946_s1 + $0x68] sm:$0xff]  ;;  %v51_v16 = vld [vmem:[%s947_s2 + $0x38] sm:$0xff] }
   0xa   :  { %v50_v17 = vld [vmem:[%s947_s2 + $0x30] sm:$0xff]  ;;  %v49_v18 = vld [vmem:[%s947_s2 + $0x28] sm:$0xff]  ;;  %v31_v19 = vld [vmem:[%s946_s1 + $0x18] sm:$0xff] }
   0xb   :  { %132 = vperm.xlu0 %563, %v58_v7   ;;  %122 = vperm.xlu1 %564, %v56_v8   ;;  %v42_v20 = vld [vmem:[%s946_s1 + $0x70] sm:$0xff]  ;;  %v48_v21 = vld [vmem:[%s947_s2 + $0x20] sm:$0xff]  ;;  %v47_v22 = vld [vmem:[%s947_s2 + $0x18] sm:$0xff] }
   0xc   :  { %529 = vmatmul.msk.f32.gmra.mxu0 %vm140_vm1, %v29_v9  ;;  %540 = vmatmul.msk.f32.gmra.mxu2 %vm140_vm1, %v40_v10  ;;  %v46_v23 = vld [vmem:[%s947_s2 + $0x10] sm:$0xff]  ;;  %v32_v24 = vld [vmem:[%s946_s1 + $0x20] sm:$0xff]  ;;  %v43_v25 = vld [vmem:[%s946_s1 + $0x78] sm:$0xff] }
   0xd   :  { %v45_v26 = vld [vmem:[%s947_s2 + $0x8] sm:$0xff]  ;;  %v305_v27 = vld [vmem:[%s949_s4 + $0x78] sm:$0xff]  ;;  %v44_v28 = vld [vmem:[%s947_s2] sm:$0xff] }
   0xe   :  { %112 = vperm.xlu2 %565, %v54_v11   ;;  %v33_v29 = vld [vmem:[%s946_s1 + $0x28] sm:$0xff]  ;;  %v304_v30 = vld [vmem:[%s949_s4 + $0x70] sm:$0xff]  ;;  %v302_v31 = vld [vmem:[%s949_s4 + $0x60] sm:$0xff] }
   0xf   :  { %v303_v32 = vld [vmem:[%s949_s4 + $0x68] sm:$0xff]  ;;  %v34_v33 = vld [vmem:[%s946_s1 + $0x30] sm:$0xff]  ;;  %v301_v34 = vld [vmem:[%s949_s4 + $0x58] sm:$0xff] }
  0x10   :  { %v299_v35 = vld [vmem:[%s949_s4 + $0x48] sm:$0xff]  ;;  %v300_v36 = vld [vmem:[%s949_s4 + $0x50] sm:$0xff]  ;;  %v35_v37 = vld [vmem:[%s946_s1 + $0x38] sm:$0xff] }
  0x11   :  { %v298_v38 = vld [vmem:[%s949_s4 + $0x40] sm:$0xff]  ;;  %v296_v39 = vld [vmem:[%s949_s4 + $0x30] sm:$0xff]  ;;  %v297_v40 = vld [vmem:[%s949_s4 + $0x38] sm:$0xff] }
  0x12   :  { %v36_v41 = vld [vmem:[%s946_s1 + $0x40] sm:$0xff]  ;;  %v295_v42 = vld [vmem:[%s949_s4 + $0x28] sm:$0xff]  ;;  %v293_v43 = vld [vmem:[%s949_s4 + $0x18] sm:$0xff] }
  0x13   :  { %107 = vperm.xlu0 %563, %v53_v12   ;;  %102 = vperm.xlu1 %564, %v52_v13   ;;  %v294_v44 = vld [vmem:[%s949_s4 + $0x20] sm:$0xff]  ;;  %v37_v45 = vld [vmem:[%s946_s1 + $0x48] sm:$0xff]  ;;  %v292_v46 = vld [vmem:[%s949_s4 + $0x10] sm:$0xff] }
  0x14   :  { %530 = vmatmul.msk.f32.gmra.mxu0 %vm140_vm1, %v30_v14  ;;  %541 = vmatmul.msk.f32.gmra.mxu2 %vm140_vm1, %v41_v15  ;;  %v290_v47 = vld [vmem:[%s949_s4] sm:$0xff]  ;;  %v291_v48 = vld [vmem:[%s949_s4 + $0x8] sm:$0xff]  ;;  %v38_v49 = vld [vmem:[%s946_s1 + $0x50] sm:$0xff] }
  0x15   :  { %v468_v50 = vld [vmem:[%s951_s6] sm:$0xff] }
  0x16   :  { %97 = vperm.xlu2 %565, %v51_v16  }
  0x1b   :  { %92 = vperm.xlu0 %563, %v50_v17   ;;  %87 = vperm.xlu1 %564, %v49_v18  }
  0x1c   :  { %531 = vmatmul.msk.f32.gmra.mxu0 %vm140_vm1, %v31_v19  ;;  %542 = vmatmul.msk.f32.gmra.mxu2 %vm140_vm1, %v42_v20 }
  0x1e   :  { %82 = vperm.xlu2 %565, %v48_v21  }
  0x23   :  { %77 = vperm.xlu0 %563, %v47_v22   ;;  %72 = vperm.xlu1 %564, %v46_v23  }
  0x24   :  { %532 = vmatmul.msk.f32.gmra.mxu0 %vm140_vm1, %v32_v24  ;;  %543 = vmatmul.msk.f32.gmra.mxu2 %vm140_vm1, %v43_v25 }
  0x26   :  { %67 = vperm.xlu2 %565, %v45_v26  }
  0x2b   :  { %383 = vperm.xlu1 %564, %v305_v27   ;;  %62 = vperm.xlu0 %563, %v44_v28  }
  0x2c   :  { %533 = vmatmul.msk.f32.gmra.mxu0 %vm140_vm1, %v33_v29 }
  0x2e   :  { %378 = vperm.xlu2 %565, %v304_v30  }
  0x33   :  { %368 = vperm.xlu1 %564, %v302_v31   ;;  %373 = vperm.xlu0 %563, %v303_v32  }
  0x34   :  { %534 = vmatmul.msk.f32.gmra.mxu0 %vm140_vm1, %v34_v33 }
  0x36   :  { %363 = vperm.xlu2 %565, %v301_v34  }
  0x3b   :  { %353 = vperm.xlu1 %564, %v299_v35   ;;  %358 = vperm.xlu0 %563, %v300_v36  }
  0x3c   :  { %535 = vmatmul.msk.f32.gmra.mxu0 %vm140_vm1, %v35_v37 }
  0x3e   :  { %348 = vperm.xlu2 %565, %v298_v38  }
  0x43   :  { %338 = vperm.xlu1 %564, %v296_v39   ;;  %343 = vperm.xlu0 %563, %v297_v40  }
  0x44   :  { %536 = vmatmul.msk.f32.gmra.mxu0 %vm140_vm1, %v36_v41 }
  0x46   :  { %333 = vperm.xlu2 %565, %v295_v42  }
  0x4b   :  { %323 = vperm.xlu1 %564, %v293_v43   ;;  %328 = vperm.xlu0 %563, %v294_v44  }
  0x4c   :  { %537 = vmatmul.msk.f32.gmra.mxu0 %vm140_vm1, %v37_v45 }
  0x4e   :  { %318 = vperm.xlu2 %565, %v292_v46  }
  0x53   :  { %308 = vperm.xlu1 %564, %v290_v47   ;;  %313 = vperm.xlu0 %563, %v291_v48  }
  0x54   :  { %538 = vmatmul.msk.f32.gmra.mxu0 %vm140_vm1, %v38_v49 }
  0x56   :  { %471 = vperm.xlu2 %565, %v468_v50   ;;  %v274_v50 = vld [vmem:[%s948_s3] sm:$0xff] }
  0x60   :  { %v118_v6 = vpop.permute.xlu2 %117 }
  0x68   :  { %v113_v15 = vpop.permute.xlu2 %112 }
  0x70   :  { %v98_v20 = vpop.permute.xlu2 %97 }
  0x75   :  { %v138_v58 = vpop.permute.xlu0 %137  ;;  %v128_v59 = vpop.permute.xlu1 %127 }
  0x78   :  { %v83_v27 = vpop.permute.xlu2 %82 }
  0x7d   :  { %v133_v62 = vpop.permute.xlu0 %132  ;;  %v123_v3 = vpop.permute.xlu1 %122 }
  0x80   :  { %v68_v38 = vpop.permute.xlu2 %67 }
  0x81   :  { %v870_v51 = vpop.f32.mrf.mxu0 }
  0x85   :  { %v108_v17 = vpop.permute.xlu0 %107  ;;  %v103_v18 = vpop.permute.xlu1 %102 }
  0x87   :  { %v243_v52 = vpop.f32.mrf.mxu2 }
  0x88   :  { %v244_v7 = vadd.f32 %v243_v52, %v118_v6 }
  0x89   :  { %v872_v53 = vpop.f32.mrf.mxu0 }
  0x8a   :  { %v214_v43 = vadd.f32 %v872_v53, %v68_v38  ;;  %v275_v53 = vld [vmem:[%s948_s3 + $0x8] sm:$0xff] }
  0x8d   :  { %v93_v21 = vpop.permute.xlu0 %92  ;;  %v88_v25 = vpop.permute.xlu1 %87 }
  0x8f   :  { %v246_v54 = vpop.f32.mrf.mxu2 }
  0x90   :  { %v247_v5 = vadd.f32 %v246_v54, %v123_v3  ;;  %v283_v54 = vld [vmem:[%s948_s3 + $0x48] sm:$0xff] }
  0x91   :  { %v874_v55 = vpop.f32.mrf.mxu0 }
  0x95   :  { %v78_v29 = vpop.permute.xlu0 %77  ;;  %v73_v35 = vpop.permute.xlu1 %72 }
  0x96   :  { %v217_v40 = vadd.f32 %v874_v55, %v73_v35  ;;  %v276_v55 = vld [vmem:[%s948_s3 + $0x10] sm:$0xff] }
  0x97   :  { %v249_v56 = vpop.f32.mrf.mxu2 }
  0x98   :  { %v250_v1 = vadd.f32 %v249_v56, %v128_v59  ;;  %v284_v56 = vld [vmem:[%s948_s3 + $0x50] sm:$0xff]  ;;  %v278_v59 = vld [vmem:[%s948_s3 + $0x20] sm:$0xff] }
  0x99   :  { %v876_v57 = vpop.f32.mrf.mxu0 }
  0x9a   :  { %v220_v37 = vadd.f32 %v876_v57, %v78_v29  ;;  %v277_v57 = vld [vmem:[%s948_s3 + $0x18] sm:$0xff] }
  0x9d   :  { %v63_v41 = vpop.permute.xlu0 %62 }
  0x9e   :  { %v211_v45 = vadd.f32 %v870_v51, %v63_v41  ;;  %v282_v51 = vld [vmem:[%s948_s3 + $0x40] sm:$0xff] }
  0x9f   :  { %v252_v60 = vpop.f32.mrf.mxu2 }
  0xa0   :  { %v253_v63 = vadd.f32 %v252_v60, %v133_v62  ;;  %v286_v60 = vld [vmem:[%s948_s3 + $0x60] sm:$0xff]  ;;  %v287_v62 = vld [vmem:[%s948_s3 + $0x68] sm:$0xff] }
  0xa1   :  { %v222_v61 = vpop.f32.mrf.mxu0 }
  0xa2   :  { %566 = vtanh.f32 %v253_v63  ;;  %v223_v34 = vadd.f32 %v222_v61, %v83_v27  ;;  %v279_v61 = vld [vmem:[%s948_s3 + $0x28] sm:$0xff]  ;;  %v280_v63 = vld [vmem:[%s948_s3 + $0x30] sm:$0xff] }
  0xa7   :  { %v255_v0 = vpop.f32.mrf.mxu2 }
  0xa8   :  { %v256_v2 = vadd.f32 %v255_v0, %v138_v58  ;;  %v567_v8 = vpop.eup %566  ;;  %v285_v58 = vld [vmem:[%s948_s3 + $0x58] sm:$0xff]  ;;  %v288_v0 = vld [vmem:[%s948_s3 + $0x70] sm:$0xff] }
  0xa9   :  { %v225_v4 = vpop.f32.mrf.mxu0 }
  0xaa   :  { %568 = vtanh.f32 %v256_v2  ;;  %v226_v32 = vadd.f32 %v225_v4, %v88_v25  ;;  %v289_v2 = vld [vmem:[%s948_s3 + $0x78] sm:$0xff] }
  0xab   :  { %570 = vtanh.f32 %v250_v1  ;;  %v281_v1 = vld [vmem:[%s948_s3 + $0x38] sm:$0xff] }
  0xac   :  { %572 = vtanh.f32 %v247_v5 }
  0xad   :  { %574 = vtanh.f32 %v244_v7 }
  0xb0   :  { %v569_v9 = vpop.eup %568 }
  0xb1   :  { %v228_v10 = vpop.f32.mrf.mxu0  ;;  %386 = vmatpush.msra.mxu1 %v569_v9  ;;  %545 = vmatpush.msra.mxu3 %v569_v9  ;;  %v571_v11 = vpop.eup %570 }
  0xb2   :  { %v573_v12 = vpop.eup %572  ;;  %v229_v30 = vadd.f32 %v228_v10, %v93_v21 }
  0xb3   :  { %387 = vmatpush.msra.mxu1 %v567_v8  ;;  %546 = vmatpush.msra.mxu3 %v567_v8  ;;  %v575_v13 = vpop.eup %574 }
  0xb5   :  { %388 = vmatpush.msra.mxu1 %v571_v11  ;;  %547 = vmatpush.msra.mxu3 %v571_v11 }
  0xb7   :  { %389 = vmatpush.msra.mxu1 %v573_v12  ;;  %548 = vmatpush.msra.mxu3 %v573_v12  ;;  %v384_v12 = vpop.permute.xlu1 %383 }
  0xb9   :  { %v231_v14 = vpop.f32.mrf.mxu0  ;;  %390 = vmatpush.msra.mxu1 %v575_v13  ;;  %549 = vmatpush.msra.mxu3 %v575_v13 }
  0xba   :  { %v232_v28 = vadd.f32 %v231_v14, %v98_v20  ;;  %v379_v14 = vpop.permute.xlu2 %378 }
  0xc1   :  { %v234_v16 = vpop.f32.mrf.mxu0 }
  0xc2   :  { %v235_v26 = vadd.f32 %v234_v16, %v103_v18  ;;  %v374_v16 = vpop.permute.xlu0 %373  ;;  %v364_v20 = vpop.permute.xlu2 %363 }
  0xc9   :  { %v237_v19 = vpop.f32.mrf.mxu0 }
  0xca   :  { %v238_v23 = vadd.f32 %v237_v19, %v108_v17  ;;  %v369_v17 = vpop.permute.xlu1 %368  ;;  %v359_v21 = vpop.permute.xlu0 %358 }
  0xd1   :  { %v240_v22 = vpop.f32.mrf.mxu0 }
  0xd2   :  { %v241_v24 = vadd.f32 %v240_v22, %v113_v15  ;;  %v354_v22 = vpop.permute.xlu1 %353 }
  0xd4   :  { %576 = vtanh.f32 %v241_v24 }
  0xd5   :  { %578 = vtanh.f32 %v238_v23 }
  0xd6   :  { %580 = vtanh.f32 %v235_v26 }
  0xd7   :  { %582 = vtanh.f32 %v232_v28  ;;  %v349_v28 = vpop.permute.xlu2 %348 }
  0xd8   :  { %584 = vtanh.f32 %v229_v30  ;;  %v344_v30 = vpop.permute.xlu0 %343 }
  0xd9   :  { %586 = vtanh.f32 %v226_v32 }
  0xda   :  { %v577_v31 = vpop.eup %576  ;;  %588 = vtanh.f32 %v223_v34  ;;  %v339_v32 = vpop.permute.xlu1 %338 }
  0xdb   :  { %391 = vmatpush.msra.mxu1 %v577_v31  ;;  %550 = vmatpush.msra.mxu3 %v577_v31  ;;  %v579_v33 = vpop.eup %578  ;;  %590 = vtanh.f32 %v220_v37 }
  0xdc   :  { %v581_v36 = vpop.eup %580  ;;  %592 = vtanh.f32 %v217_v40 }
  0xdd   :  { %392 = vmatpush.msra.mxu1 %v579_v33  ;;  %551 = vmatpush.msra.mxu3 %v579_v33  ;;  %v583_v39 = vpop.eup %582  ;;  %594 = vtanh.f32 %v214_v43 }
  0xde   :  { %v585_v42 = vpop.eup %584  ;;  %596 = vtanh.f32 %v211_v45 }
  0xdf   :  { %393 = vmatpush.msra.mxu1 %v581_v36  ;;  %552 = vmatpush.msra.mxu3 %v581_v36  ;;  %v587_v44 = vpop.eup %586  ;;  %v334_v40 = vpop.permute.xlu2 %333 }
  0xe0   :  { %v589_v46 = vpop.eup %588  ;;  %v329_v43 = vpop.permute.xlu0 %328 }
  0xe1   :  { %394 = vmatpush.msra.mxu1 %v583_v39  ;;  %553 = vmatpush.msra.mxu3 %v583_v39  ;;  %v591_v47 = vpop.eup %590 }
  0xe2   :  { %v593_v48 = vpop.eup %592 }
  0xe3   :  { %395 = vmatpush.msra.mxu1 %v585_v42  ;;  %554 = vmatpush.msra.mxu3 %v585_v42  ;;  %v595_v49 = vpop.eup %594 }
  0xe4   :  { %v597_v52 = vpop.eup %596 }
  0xe5   :  { %396 = vmatpush.msra.mxu1 %v587_v44  ;;  %555 = vmatpush.msra.mxu3 %v587_v44 }
  0xe7   :  { %397 = vmatpush.msra.mxu1 %v589_v46  ;;  %556 = vmatpush.msra.mxu3 %v589_v46  ;;  %v324_v46 = vpop.permute.xlu1 %323 }
  0xe9   :  { %398 = vmatpush.msra.mxu1 %v591_v47  ;;  %557 = vmatpush.msra.mxu3 %v591_v47 }
  0xeb   :  { %399 = vmatpush.msra.mxu1 %v593_v48  ;;  %558 = vmatpush.msra.mxu3 %v593_v48 }
  0xed   :  { %400 = vmatpush.msra.mxu1 %v595_v49  ;;  %559 = vmatpush.msra.mxu3 %v595_v49 }
  0xef   :  { %401 = vmatpush.msra.mxu1 %v597_v52  ;;  %560 = vmatpush.msra.mxu3 %v597_v52 }
  0xf0   :  { %402 = vmatmul.f32.vlgmr.msra.gmra.mxu1 %v274_v50  ;;  %426 = vmatmul.f32.vlgmr.msra.gmra.mxu3 %v282_v51 }
  0xf8   :  { %405 = vmatmul.f32.gmra.mxu1 %v275_v53  ;;  %429 = vmatmul.f32.gmra.mxu3 %v283_v54  ;;  %v319_v53 = vpop.permute.xlu2 %318 }
 0x100   :  { %408 = vmatmul.f32.gmra.mxu1 %v276_v55  ;;  %432 = vmatmul.f32.gmra.mxu3 %v284_v56  ;;  %v314_v56 = vpop.permute.xlu0 %313 }
 0x108   :  { %411 = vmatmul.f32.gmra.mxu1 %v277_v57  ;;  %435 = vmatmul.f32.gmra.mxu3 %v285_v58 }
 0x110   :  { %414 = vmatmul.f32.gmra.mxu1 %v278_v59  ;;  %438 = vmatmul.f32.gmra.mxu3 %v286_v60  ;;  %v309_v59 = vpop.permute.xlu1 %308 }
 0x118   :  { %417 = vmatmul.f32.gmra.mxu1 %v279_v61  ;;  %441 = vmatmul.f32.gmra.mxu3 %v287_v62 }
 0x120   :  { %420 = vmatmul.f32.gmra.mxu1 %v280_v63  ;;  %444 = vmatmul.f32.gmra.mxu3 %v288_v0 }
 0x128   :  { %423 = vmatmul.f32.gmra.mxu1 %v281_v1  ;;  %447 = vmatmul.f32.gmra.mxu3 %v289_v2  ;;  %v467_v2 = vld [vmem:[%s950_s5] sm:$0xff]  ;;  %s663_s5 = smov [#allocation2]  }
 0x129   :  { %s516_s28 = sshll.u32 %s663_s5, 4  ;;  %s517_s28 = int_to_ptr.vmem [resolvable:$true] %s516_s28 }
 0x16d   :  { %v930_v3 = vpop.f32.mrf.mxu1 }
 0x16e   :  { %v404_v61 = vadd.f32 %v930_v3, %v309_v59  ;;  %v472_v3 = vpop.permute.xlu2 %471 }
 0x173   :  { %v427_v4 = vpop.f32.mrf.mxu3 }
 0x174   :  { %v428_v39 = vadd.f32 %v427_v4, %v349_v28 }
 0x175   :  { %v932_v5 = vpop.f32.mrf.mxu1 }
 0x176   :  { %v407_v58 = vadd.f32 %v932_v5, %v314_v56 }
 0x17b   :  { %v430_v6 = vpop.f32.mrf.mxu3 }
 0x17c   :  { %v431_v36 = vadd.f32 %v430_v6, %v354_v22 }
 0x17d   :  { %v934_v8 = vpop.f32.mrf.mxu1 }
 0x17e   :  { %v410_v55 = vadd.f32 %v934_v8, %v319_v53 }
 0x183   :  { %v433_v7 = vpop.f32.mrf.mxu3 }
 0x184   :  { %v434_v34 = vadd.f32 %v433_v7, %v359_v21 }
 0x185   :  { %v412_v10 = vpop.f32.mrf.mxu1 }
 0x186   :  { %v413_v52 = vadd.f32 %v412_v10, %v324_v46 }
 0x18b   :  { %v436_v9 = vpop.f32.mrf.mxu3 }
 0x18c   :  { %v437_v31 = vadd.f32 %v436_v9, %v364_v20 }
 0x18d   :  { %v415_v13 = vpop.f32.mrf.mxu1 }
 0x18e   :  { %v416_v50 = vadd.f32 %v415_v13, %v329_v43 }
 0x193   :  { %v439_v11 = vpop.f32.mrf.mxu3 }
 0x194   :  { %v440_v29 = vadd.f32 %v439_v11, %v369_v17 }
 0x195   :  { %v418_v18 = vpop.f32.mrf.mxu1 }
 0x196   :  { %v419_v48 = vadd.f32 %v418_v18, %v334_v40 }
 0x19b   :  { %v442_v15 = vpop.f32.mrf.mxu3 }
 0x19c   :  { %v443_v27 = vadd.f32 %v442_v15, %v374_v16 }
 0x19d   :  { %v421_v26 = vpop.f32.mrf.mxu1 }
 0x19e   :  { %v422_v45 = vadd.f32 %v421_v26, %v339_v32 }
 0x1a3   :  { %v445_v19 = vpop.f32.mrf.mxu3 }
 0x1a4   :  { %v446_v24 = vadd.f32 %v445_v19, %v379_v14 }
 0x1a5   :  { %v424_v37 = vpop.f32.mrf.mxu1 }
 0x1a6   :  { %v425_v42 = vadd.f32 %v424_v37, %v344_v30 }
 0x1ab   :  { %v448_v23 = vpop.f32.mrf.mxu3 }
 0x1ac   :  { %v449_v25 = vadd.f32 %v448_v23, %v384_v12  ;;  %v506_v12 = vlaneseq }
 0x1ae   :  { %598 = vtanh.f32 %v449_v25  ;;  %v507_v14 = vshrl.u32 %v506_v12, 7 }
 0x1af   :  { %600 = vtanh.f32 %v446_v24 }
 0x1b0   :  { %602 = vtanh.f32 %v443_v27  ;;  %vm508_vm2 = vcmp.lt.s32.totalorder %v507_v14, 2 }
 0x1b1   :  { %604 = vtanh.f32 %v440_v29 }
 0x1b2   :  { %606 = vtanh.f32 %v437_v31 }
 0x1b3   :  { %608 = vtanh.f32 %v434_v34 }
 0x1b4   :  { %v599_v33 = vpop.eup %598  ;;  %610 = vtanh.f32 %v431_v36 }
 0x1b5   :  { %474 = vmatpush.msrb.mxu2 %v599_v33  ;;  %v601_v35 = vpop.eup %600  ;;  %612 = vtanh.f32 %v428_v39 }
 0x1b6   :  { %v603_v38 = vpop.eup %602  ;;  %614 = vtanh.f32 %v425_v42 }
 0x1b7   :  { %475 = vmatpush.msrb.mxu2 %v601_v35  ;;  %v605_v41 = vpop.eup %604  ;;  %616 = vtanh.f32 %v422_v45 }
 0x1b8   :  { %v607_v44 = vpop.eup %606  ;;  %618 = vtanh.f32 %v419_v48 }
 0x1b9   :  { %476 = vmatpush.msrb.mxu2 %v603_v38  ;;  %v609_v47 = vpop.eup %608  ;;  %620 = vtanh.f32 %v416_v50 }
 0x1ba   :  { %v611_v49 = vpop.eup %610  ;;  %622 = vtanh.f32 %v413_v52 }
 0x1bb   :  { %477 = vmatpush.msrb.mxu2 %v605_v41  ;;  %v613_v51 = vpop.eup %612  ;;  %624 = vtanh.f32 %v410_v55 }
 0x1bc   :  { %v615_v54 = vpop.eup %614  ;;  %626 = vtanh.f32 %v407_v58 }
 0x1bd   :  { %478 = vmatpush.msrb.mxu2 %v607_v44  ;;  %v617_v57 = vpop.eup %616  ;;  %628 = vtanh.f32 %v404_v61 }
 0x1be   :  { %v619_v60 = vpop.eup %618 }
 0x1bf   :  { %479 = vmatpush.msrb.mxu2 %v609_v47  ;;  %v621_v62 = vpop.eup %620 }
 0x1c0   :  { %v623_v63 = vpop.eup %622 }
 0x1c1   :  { %480 = vmatpush.msrb.mxu2 %v611_v49  ;;  %v625_v0 = vpop.eup %624 }
 0x1c2   :  { %v627_v1 = vpop.eup %626 }
 0x1c3   :  { %481 = vmatpush.msrb.mxu2 %v613_v51  ;;  %v629_v4 = vpop.eup %628 }
 0x1c5   :  { %482 = vmatpush.msrb.mxu2 %v615_v54 }
 0x1c7   :  { %483 = vmatpush.msrb.mxu2 %v617_v57 }
 0x1c9   :  { %484 = vmatpush.msrb.mxu2 %v619_v60 }
 0x1cb   :  { %485 = vmatpush.msrb.mxu2 %v621_v62 }
 0x1cd   :  { %486 = vmatpush.msrb.mxu2 %v623_v63 }
 0x1cf   :  { %487 = vmatpush.msrb.mxu2 %v625_v0 }
 0x1d1   :  { %488 = vmatpush.msrb.mxu2 %v627_v1 }
 0x1d3   :  { %489 = vmatpush.msrb.mxu2 %v629_v4 }
 0x1d4   :  { %490 = vmatmul.f32.vlgmr.msrb.gmra.mxu2 %v467_v2 }
 0x257   :  { %v491_v5 = vpop.f32.mrf.mxu2 }
 0x258   :  { %v492_v6 = vadd.f32 %v491_v5, %v472_v3 }
 0x25a   :  { %630 = vtanh.f32 %v492_v6 }
 0x260   :  { %v631_v7 = vpop.eup %630 }
 0x261   :  { %v495_v8 = vmul.f32 1.442695, %v631_v7 }
 0x263   :  { %632 = vpow2.f32 %v495_v8 }
 0x269   :  { %v633_v9 = vpop.eup %632 }
 0x26a   :  { %v497_v10 = vadd.f32 1.0, %v633_v9  ;;  %v500_v11 = vmul.f32 -0.5, %v633_v9  ;;  %v503_v15 = vand.u32 2147483647, %v633_v9 }
 0x26c   :  { %634 = vlog2.f32 %v497_v10  ;;  %v501_v13 = vadd.f32 1.0, %v500_v11  ;;  %vm504_vm3 = vcmp.lt.f32.partialorder %v503_v15, 0.0004427343 }
 0x26e   :  { %v502_v18 = vmul.f32 %v633_v9, %v501_v13 }
 0x272   :  { %v635_v16 = vpop.eup %634 }
 0x273   :  { %v499_v17 = vmul.f32 0.6931472, %v635_v16 }
 0x275   :  { %v505_v19 = vsel %vm504_vm3, %v502_v18, %v499_v17 }
 0x276   :  { %v509_v20 = vsel %vm508_vm2, %v631_v7, %v505_v19 }
 0x277   :  { %510 = vst [vmem:[#allocation2] sm:$0xff] %v509_v20 }
 0x278   :  { %521 = dma.vmem_to_hbm [thread:$0]  %s517_s28, 128, %s519_s8, [#allocation3]  }
 0x279   :  { %660 = dma.done.wait [#allocation3], 128  }
 0x27a   :  { %661 = vsyncadd [#allocation3], 4294967168 }
 0x27b   :  { %526 = vsyncpa [#allocation3], 1 }

</bundles_post_ra>
